<compile_context>
chip_gen: v7x
topology: tpu7x:2x2x1
jax: 0.10.0
libtpu: 0.0.40
codegen_flags: <defaults>
</compile_context>

<pallas_src>
import functools

import jax
import jax.numpy as jnp
from jax.experimental import pallas as pl
from jax.experimental.pallas import tpu as pltpu


def _round_up(n, m):
    return ((n + m - 1) // m) * m


def _sublane(dtype):
    """Sublane packing for the dtype: (8,128) f32, (16,128) bf16, (32,128) i8."""
    return {4: 8, 2: 16, 1: 32}.get(jnp.dtype(dtype).itemsize, 8)


def _tpu_vmem_and_cores():
    """(physical VMEM bytes, TensorCores per chip), conservative fallback."""
    vmem_cap = 64 * 1024 * 1024
    cores = 2
    try:
        info = pltpu.get_tpu_info()
        cap = getattr(info, "vmem_capacity_bytes", None)
        if cap:
            vmem_cap = int(cap)
        n = getattr(info, "num_cores", None) or getattr(info, "core_count", None)
        if n:
            cores = int(n)
        else:
            # v7x exposes 64 MiB per TensorCore and has 2 TCs; v5e/v6e have 1.
            cores = 2 if vmem_cap <= 64 * 1024 * 1024 else 1
    except Exception:
        pass
    return vmem_cap, cores


# -----------------------------------------------------------------------------
# Kernels
# -----------------------------------------------------------------------------
def _pool_single_step_kernel(x_ref, o_ref, *, hw):
    """Whole HW reduction in one tile: sum + max directly, no scratch.

    Rows past NC in the last block are padded garbage; their results land
    outside the (NC, 1) out_shape and Pallas discards the OOB writes, so they
    never become visible (do not change out_shape without revisiting this).
    """
    x = x_ref[...].astype(jnp.float32)
    s = jnp.sum(x, axis=-1, keepdims=True)
    m = jnp.max(x, axis=-1, keepdims=True)
    o_ref[...] = (s * (1.0 / float(hw)) + m).astype(o_ref.dtype)


def _pool_multi_step_kernel(x_ref, o_ref, sum_ref, max_ref, *, hw, hw_tile):
    """HW tiled along the trailing 'arbitrary' grid axis.

    sum_ref / max_ref are WIDE (row_tile, 128) f32 accumulators: steady-state
    steps do only lane-wise VPU adds/maxes over static 128-lane slabs of the
    loaded tile.  The remainder mask and the single cross-lane reduce happen
    only on the last step.  Since grid_hw > 1 guarantees at least one fully
    valid step, every accumulator lane sees real data before finalize.
    """
    k = pl.program_id(1)
    last = pl.num_programs(1) - 1

    @pl.when(k == 0)
    def _init():
        sum_ref[...] = jnp.zeros_like(sum_ref)
        max_ref[...] = jnp.full_like(max_ref, -jnp.inf)

    x = x_ref[...].astype(jnp.float32)
    n_slabs = hw_tile // 128  # hw_tile is a multiple of 128 by construction

    def _accumulate(x_for_sum, x_for_max):
        s = sum_ref[...]
        m = max_ref[...]
        for j in range(n_slabs):
            lo = j * 128
            s = s + x_for_sum[:, lo:lo + 128]
            m = jnp.maximum(m, x_for_max[:, lo:lo + 128])
        sum_ref[...] = s
        max_ref[...] = m

    if hw % hw_tile != 0:
        # Unmasked fast path for every fully valid tile ...
        @pl.when(k < last)
        def _steady():
            _accumulate(x, x)

        # ... masking only for the final, partially valid tile.
        @pl.when(k == last)
        def _remainder():
            col = k * hw_tile + jax.lax.broadcasted_iota(jnp.int32, x.shape, 1)
            valid = col < hw
            _accumulate(jnp.where(valid, x, 0.0), jnp.where(valid, x, -jnp.inf))
    else:
        _accumulate(x, x)

    @pl.when(k == last)
    def _finalize():
        total = jnp.sum(sum_ref[...], axis=-1, keepdims=True)
        mx = jnp.max(max_ref[...], axis=-1, keepdims=True)
        o_ref[...] = (total * (1.0 / float(hw)) + mx).astype(o_ref.dtype)


# -----------------------------------------------------------------------------
# Wrapper
# -----------------------------------------------------------------------------
def adaptive_avg_max_pool2d(x, *, per_buffer_bytes=None):
    """x: (N, C, H, W) -> (N, C, 1, 1), value = mean_HW(x) + max_HW(x)."""
    N, C, H, W = x.shape
    # Pooling inputs are float; promote anything else so the -inf mask, f32
    # accumulation and the mean are well defined.
    if not jnp.issubdtype(x.dtype, jnp.floating):
        x = x.astype(jnp.float32)
    out_dtype = x.dtype

    NC = N * C
    HW = H * W
    x2d = x.reshape(NC, HW)

    itemsize = jnp.dtype(x.dtype).itemsize
    sub = _sublane(x.dtype)
    hw_padded = _round_up(HW, 128)            # lane padding of the VMEM block

    # ---- generation-aware budgets (always from PADDED footprints) ----
    vmem_cap, n_cores = _tpu_vmem_and_cores()
    if vmem_cap >= (96 << 20):                # v5e / v6e: 128 MiB VMEM
        default_per_buffer = 16 << 20
        vmem_clamp = 80 << 20
    else:                                     # v7x: 64 MiB VMEM
        default_per_buffer = 8 << 20
        vmem_clamp = 48 << 20
    per_buffer = per_buffer_bytes or default_per_buffer

    # ---- spatial (reduction) tiling ----
    if hw_padded * sub * itemsize <= per_buffer:
        hw_tile = HW                          # whole reduction in one tile
        hw_tile_padded = hw_padded
    else:
        # Tile HW in 128-lane multiples along a trailing "arbitrary" axis.
        budget = (per_buffer // (sub * itemsize)) // 128 * 128
        hw_tile = max(128, min(budget, (HW // 128) * 128, 16384))
        hw_tile_padded = hw_tile
    grid_hw = pl.cdiv(HW, hw_tile)

    # ---- row tiling (dtype-sublane aligned, sized from padded bytes) ----
    row_tile = (per_buffer // (hw_tile_padded * itemsize)) // sub * sub
    row_tile = max(sub, row_tile)
    nc_ceil = _round_up(NC, sub)
    if n_cores >= 2 and nc_ceil >= 2 * sub:
        # Keep >= 2 row blocks so both v7x TensorCores get work; skip on
        # single-TC v5e/v6e where it would only add grid-step overhead.
        row_tile = min(row_tile, max(sub, (nc_ceil // 2 // sub) * sub))
    row_tile = min(row_tile, nc_ceil)
    grid_rows = pl.cdiv(NC, row_tile)

    # ---- scoped-VMEM limit from the padded, multi-buffered footprint ----
    n_buffers = 3 if grid_hw > 1 else 2
    block_bytes = row_tile * hw_tile_padded * itemsize
    out_bytes = 2 * row_tile * 128 * itemsize
    scratch_bytes = (2 * row_tile * 128 * 4) if grid_hw > 1 else 0
    vmem_need = n_buffers * block_bytes + out_bytes + scratch_bytes + (2 << 20)
    vmem_limit = int(min(max(vmem_need, 32 << 20), vmem_clamp))

    cost = pl.CostEstimate(
        flops=2 * NC * HW,
        transcendentals=0,
        bytes_accessed=NC * HW * itemsize + NC * itemsize,
    )

    if grid_hw == 1:
        kernel = functools.partial(_pool_single_step_kernel, hw=HW)
        grid_spec = pltpu.PrefetchScalarGridSpec(
            num_scalar_prefetch=0,
            grid=(grid_rows,),
            in_specs=[pl.BlockSpec((row_tile, HW), lambda i: (i, 0))],
            out_specs=pl.BlockSpec((row_tile, 1), lambda i: (i, 0)),
        )
        dim_sem = ("parallel",)
    else:
        kernel = functools.partial(_pool_multi_step_kernel, hw=HW, hw_tile=hw_tile)
        # Third input buffer smooths DMA-issue gaps on long HW reductions.
        try:
            in_spec = pl.BlockSpec((row_tile, hw_tile), lambda i, k: (i, k),
                                   pipeline_mode=pl.Buffered(3))
        except Exception:
            in_spec = pl.BlockSpec((row_tile, hw_tile), lambda i, k: (i, k))
        grid_spec = pltpu.PrefetchScalarGridSpec(
            num_scalar_prefetch=0,
            grid=(grid_rows, grid_hw),
            in_specs=[in_spec],
            out_specs=pl.BlockSpec((row_tile, 1), lambda i, k: (i, 0)),
            scratch_shapes=[
                pltpu.VMEM((row_tile, 128), jnp.float32),   # running sum
                pltpu.VMEM((row_tile, 128), jnp.float32),   # running max
            ],
        )
        dim_sem = ("parallel", "arbitrary")

    out2d = pl.pallas_call(
        kernel,
        out_shape=jax.ShapeDtypeStruct((NC, 1), out_dtype),
        grid_spec=grid_spec,
        compiler_params=pltpu.CompilerParams(
            dimension_semantics=dim_sem,
            vmem_limit_bytes=vmem_limit,
        ),
        cost_estimate=cost,
    )(x2d)

    return out2d.reshape(N, C, 1, 1)


def _reference(x):
    xf = x.reshape(x.shape[0], x.shape[1], -1).astype(jnp.float32)
    ref = jnp.mean(xf, axis=-1) + jnp.max(xf, axis=-1)
    return ref.reshape(x.shape[0], x.shape[1], 1, 1)


if __name__ == "__main__":
    # --- primary check: small shape consistent with the module ---
    key = jax.random.PRNGKey(0)
    N, C, H, W = 2, 4, 16, 16
    x = jax.random.normal(key, (N, C, H, W), dtype=jnp.float32)
    out = jax.block_until_ready(adaptive_avg_max_pool2d(x))
    assert out.shape == (N, C, 1, 1), out.shape
    assert jnp.allclose(out, _reference(x), atol=1e-5, rtol=1e-5), "f32 mismatch"

    # --- secondary checks: bf16 sublane path, and the HW-tiled (multi-step,
    #     remainder-masked) path via a small forced per-buffer budget. ---
    xb = jax.random.normal(jax.random.PRNGKey(1), (2, 16, 14, 14), dtype=jnp.bfloat16)
    outb = jax.block_until_ready(adaptive_avg_max_pool2d(xb))
    assert jnp.allclose(outb.astype(jnp.float32), _reference(xb),
                        atol=5e-2, rtol=5e-2), "bf16 mismatch"

    xm = jax.random.normal(jax.random.PRNGKey(2), (1, 8, 130, 130), dtype=jnp.float32)
    outm = jax.block_until_ready(
        adaptive_avg_max_pool2d(xm, per_buffer_bytes=64 * 1024))
    assert jnp.allclose(outm, _reference(xm), atol=1e-4, rtol=1e-4), "tiled mismatch"

    print("KERNEL_OK")
</pallas_src>

<mosaic_0001>
module attributes {stable_mosaic.version = 11 : i64} {
  func.func @_pool_single_step_kernel(%arg0: i32, %arg1: memref<8x256xf32, #tpu.memory_space<vmem>>, %arg2: memref<8x1xf32, #tpu.memory_space<vmem>>) attributes {dimension_semantics = [#tpu.dimension_semantics<parallel>], iteration_bounds = array<i64: 1>, scalar_prefetch = 0 : i64, scratch_operands = 0 : i64, tpu.core_type = #tpu.core_type<tc>, window_params = [{transform_indices = @transform_0, window_bounds = array<i64: 8, 256>}, {transform_indices = @transform_1, window_bounds = array<i64: 8, 1>}]} {
    %c0 = arith.constant 0 : index
    %c0_0 = arith.constant 0 : index
    %0 = vector.load %arg1[%c0, %c0_0] : memref<8x256xf32, #tpu.memory_space<vmem>>, vector<8x256xf32>
    %cst = arith.constant dense<0.000000e+00> : vector<8xf32>
    %1 = vector.multi_reduction <add>, %0, %cst [1] : vector<8x256xf32> to vector<8xf32>
    %2 = vector.shape_cast %1 : vector<8xf32> to vector<8x1xf32>
    %cst_1 = arith.constant dense<0xFF800000> : vector<8xf32>
    %3 = vector.multi_reduction <maximumf>, %0, %cst_1 [1] : vector<8x256xf32> to vector<8xf32>
    %4 = vector.shape_cast %3 : vector<8xf32> to vector<8x1xf32>
    %cst_2 = arith.constant 3.906250e-03 : f32
    %5 = vector.broadcast %cst_2 : f32 to vector<8x1xf32>
    %6 = arith.mulf %2, %5 : vector<8x1xf32>
    %7 = arith.addf %6, %4 : vector<8x1xf32>
    %c0_3 = arith.constant 0 : index
    %c0_4 = arith.constant 0 : index
    %8 = vector.load %arg2[%c0_3, %c0_4] : memref<8x1xf32, #tpu.memory_space<vmem>>, vector<8x1xf32>
    tpu.vector_store %arg2[%c0_3, %c0_4], %7 {strides = array<i32>} : memref<8x1xf32, #tpu.memory_space<vmem>>, vector<8x1xf32>,
    return
  }
  func.func @transform_0(%arg0: i32) -> (i32, i32) {
    %c0_i32 = arith.constant 0 : i32
    %c0_i32_0 = arith.constant 0 : i32
    return %arg0, %c0_i32 : i32, i32
  }
  func.func @transform_1(%arg0: i32) -> (i32, i32) {
    %c0_i32 = arith.constant 0 : i32
    %c0_i32_0 = arith.constant 0 : i32
    return %arg0, %c0_i32 : i32, i32
  }
}

</mosaic_0001>

<bundles_post_ra>
// kernel: tpu_custom_call.1
= control target key start
LH: loop header
LB: loop body
LE: loop exit
PB: predicated region body
PF: predicated region fallthrough
CT: control target
= control target key end

     0   :  { %6 = vsyncpa [#allocation3], 0  ;;  %s62_s6 = smov [#allocation2]   ;;  %s88_s0 = inlined_call_operand.hbm [shape: f32[8,256], index: 0, kind: input, shape index: {}]   ;;  %s89_s1 = inlined_call_operand.vmem [shape: f32[8,1], index: 1, kind: output, shape index: {}]  }
   0x1   :  { %s13_s7 = sshll.u32 %s62_s6, 4  ;;  %s38_s10 = scalar_lea.hbm %s88_s0, 256  ;;  %s14_s7 = int_to_ptr.vmem [resolvable:$true] %s13_s7 }
   0x2   :  { %p39_p0 = scmp.ne.s32.totalorder %s88_s0, %s38_s10  ;;  %p42_p1 = scmp.lt.u32.totalorder %s38_s10, %s88_s0 }
   0x4   :  { %p44_p2 = pnand %p42_p1, %p39_p0 }
   0x6   :  { %47 = shalt.err (!%p44_p2)
}
   0x7   :  { %s48_s15 = scalar_lea.vmem %s14_s7, 256  ;;  %p53_p4 = scmp.lt.s32.totalorder %s14_s7, %s14_s7 }
   0x8   :  { %p49_p3 = scmp.ne.s32.totalorder %s14_s7, %s48_s15  ;;  %p54_p5 = scmp.lt.s32.totalorder %s48_s15, %s48_s15 }
   0xa   :  { %p55_p6 = por %p54_p5, %p53_p4 }
   0xc   :  { %p56_p7 = pnand %p55_p6, %p49_p3 }
   0xe   :  { %59 = shalt.err (!%p56_p7)
}
   0xf   :  { %16 = dma.hbm_to_vmem [thread:$0]  %s88_s0, 256, %s14_s7, [#allocation3]  }
  0x10   :  { %60 = dma.done.wait [#allocation3], 256  }
  0x11   :  { %61 = vsyncadd [#allocation3], 4294967040  ;;  %v20_v0 = vld [vmem:[#allocation2] sm:$0xff]  ;;  %v21_v1 = vld [vmem:[#allocation2 + $0x8] sm:$0xff]  ;;  %vm30_vm0 = vcmask 7168  }
  0x12   :  { %v22_v2 = vadd.f32 %v21_v1, %v20_v0  ;;  %v25_v3 = vmax.f32 %v20_v0, %v21_v1 }
  0x14   :  { %23 = vadd.xlane.f32.xlu0 %v22_v2 }
  0x18   :  { %26 = vmax.xlane.f32.xlu0 %v25_v3 }
  0xa1   :  { %v24_v4 = vpop.xlane.xlu0 %23 }
  0xa2   :  { %v28_v5 = vmul.f32 0.00390625, %v24_v4 }
  0xa5   :  { %v27_v6 = vpop.xlane.xlu0 %26 }
  0xa6   :  { %v29_v7 = vadd.f32 %v28_v5, %v27_v6 }
  0xa8   :  { %31 = vst.msk [vmem:[%s89_s1] sm:$0xff] %vm30_vm0, %v29_v7 }
  0xa9   :  { %36 = vsyncpa [#allocation3], 1 }

</bundles_post_ra>
